<compile_context>
chip_gen: v5e
topology: v5e:2x2
jax: 0.10.0
libtpu: 0.0.40
codegen_flags: <defaults>
</compile_context>

<pallas_src>
import functools

import jax
import jax.numpy as jnp
from jax import lax
from jax.experimental import pallas as pl
from jax.experimental.pallas import tpu as pltpu

_LANES = 128
_MIB = 1024 * 1024


def _label_smoothing_kernel(x_ref, t_ref, o_ref, *, smoothing, n_total, tile_n,
                            compute_dtype):
    i = pl.program_id(0)

    x = x_ref[...]
    if x.dtype != compute_dtype:
        x = x.astype(compute_dtype)
    tn, c = x.shape

    confidence = 1.0 - smoothing

    # Numerically-stable fused log-softmax reduction (logprobs never built).
    m = jnp.max(x, axis=-1, keepdims=True)
    shifted = x - m                                               # (tn, C)
    # exp on EUP in compute dtype; accumulate the reduction in f32.
    lse = jnp.log(jnp.sum(jnp.exp(shifted), axis=-1, keepdims=True,
                          dtype=jnp.float32))                     # (tn, 1) f32

    # Single fused weighted lane reduction:
    #   loss = lse - [ confidence*shifted[tgt] + (smoothing/C)*sum(shifted) ]
    tgt = t_ref[...]                                              # (tn, 1) int32
    col = lax.broadcasted_iota(jnp.int32, (tn, c), 1)
    w = jnp.where(col == tgt,
                  jnp.asarray(confidence + smoothing / c, compute_dtype),
                  jnp.asarray(smoothing / c, compute_dtype))      # (tn, C)
    weighted = jnp.sum(shifted * w, axis=-1, keepdims=True,
                       dtype=jnp.float32)                         # (tn, 1) f32
    loss = lse - weighted                                         # (tn, 1) f32

    # Mask rows past N (ragged last tile) BEFORE the tile-level sum.
    row = lax.broadcasted_iota(jnp.int32, (tn, 1), 0) + i * tile_n
    loss = jnp.where(row < n_total, loss, 0.0)

    # Lane-dense per-tile partial sum (unmasked full-block store).
    partial = jnp.sum(loss)
    o_ref[...] = jnp.full((1, _LANES), partial, dtype=jnp.float32)


def _chip_info():
    """(tiling budget, scoped-VMEM cap, bf16 VPU/EUP available, is_v7x)."""
    kind = ""
    try:
        kind = (getattr(jax.devices()[0], "device_kind", "") or "").lower()
    except Exception:
        pass
    is_v7 = "v7" in kind
    is_v6 = "v6" in kind
    has_bf16_vpu = is_v6 or is_v7
    if is_v7:
        # 64 MiB physical VMEM per TC -> keep streaming budget well under it.
        return 20 * _MIB, 48 * _MIB, has_bf16_vpu, True
    if is_v6:
        # 128 MiB physical; large blocks needed to reach ~85% of 1.4 TB/s.
        return 48 * _MIB, 100 * _MIB, has_bf16_vpu, False
    # v5e (128 MiB VMEM, firmly HBM-bound) or unknown: big blocks, f32 compute.
    return 48 * _MIB, 100 * _MIB, False, False


def _choose_tile_n(n, c, in_itemsize, compute_itemsize, budget, want_two_tiles):
    """Pick a row-tile size.  Returns (tile_n, per_row_bytes)."""
    # VMEM bytes per row resident at once:
    #   2 * C * in_itemsize        double-buffered input block
    #   2 * C * compute_itemsize   in-kernel temporaries (shifted, weights/exp)
    #   4 * C                      int32 column iota
    per_row = 2 * c * in_itemsize + 2 * c * compute_itemsize + 4 * c
    sub = max(8, 32 // max(in_itemsize, 1))      # 8 f32 / 16 bf16 / 32 int8
    tile = budget // max(per_row, 1)
    tile = max(sub, min(2048, (tile // sub) * sub))
    if want_two_tiles and n > sub:
        # Guarantee >=2 grid steps so both v7x TensorCores get work.
        half = pl.cdiv(n, 2)
        half = pl.cdiv(half, sub) * sub
        tile = min(tile, half)
    if tile >= n:
        return n, per_row                         # single full-extent block
    return tile, per_row


def label_smoothing_loss(x, target, smoothing=0.0, *, tile_n=None):
    """x: (N, C) float32/bfloat16 logits, target: (N,) int -> scalar f32 loss."""
    n, c = x.shape
    t2d = target.astype(jnp.int32).reshape(n, 1)

    budget, limit_cap, has_bf16_vpu, is_v7 = _chip_info()
    compute_dtype = (jnp.bfloat16
                     if (has_bf16_vpu and x.dtype == jnp.bfloat16)
                     else jnp.float32)
    compute_itemsize = jnp.dtype(compute_dtype).itemsize

    if tile_n is None:
        tile_n, per_row = _choose_tile_n(n, c, x.dtype.itemsize,
                                         compute_itemsize, budget, is_v7)
    else:
        per_row = 2 * c * x.dtype.itemsize + 2 * c * compute_itemsize + 4 * c
    num_tiles = pl.cdiv(n, tile_n)

    # Scoped-VMEM limit: enough for the chosen blocks + slack, within the
    # per-generation cap.  If even the minimum tile can't fit, declare what we
    # need so any overflow fails loudly at compile time (see C-tiling TODO).
    needed = tile_n * per_row + 4 * _MIB
    vmem_limit = max(32 * _MIB, min(limit_cap, needed))
    if needed > limit_cap:
        vmem_limit = needed

    kernel = functools.partial(
        _label_smoothing_kernel,
        smoothing=float(smoothing),
        n_total=n,
        tile_n=tile_n,
        compute_dtype=compute_dtype,
    )

    cost = pl.CostEstimate(
        flops=5 * n * c,
        transcendentals=n * c + n,
        bytes_accessed=n * c * x.dtype.itemsize + n * 4 + num_tiles * _LANES * 4,
    )

    partials = pl.pallas_call(
        kernel,
        out_shape=jax.ShapeDtypeStruct((num_tiles, _LANES), jnp.float32),
        grid=(num_tiles,),
        in_specs=[
            pl.BlockSpec((tile_n, c), lambda i: (i, 0)),
            pl.BlockSpec((tile_n, 1), lambda i: (i, 0)),
        ],
        out_specs=pl.BlockSpec((1, _LANES), lambda i: (i, 0)),
        compiler_params=pltpu.CompilerParams(
            dimension_semantics=("parallel",),
            vmem_limit_bytes=int(vmem_limit),
        ),
        cost_estimate=cost,
    )(x, t2d)

    return jnp.sum(partials[:, 0]) / n


def _reference_loss(x, target, smoothing):
    xf = x.astype(jnp.float32)
    logprobs = jax.nn.log_softmax(xf, axis=-1)
    nll = -jnp.take_along_axis(logprobs, target[:, None], axis=-1)[:, 0]
    smooth = -jnp.mean(logprobs, axis=-1)
    return jnp.mean((1.0 - smoothing) * nll + smoothing * smooth)


if __name__ == "__main__":
    key = jax.random.PRNGKey(0)
    kx, kt, kx2, kt2 = jax.random.split(key, 4)
    smoothing = 0.1

    # 1) small f32 case (single tile)
    N, C = 8, 32
    x = jax.random.normal(kx, (N, C), dtype=jnp.float32)
    target = jax.random.randint(kt, (N,), 0, C, dtype=jnp.int32)
    loss = label_smoothing_loss(x, target, smoothing=smoothing)
    jax.block_until_ready(loss)
    ref = _reference_loss(x, target, smoothing)
    assert jnp.allclose(loss, ref, atol=1e-5, rtol=1e-5), (loss, ref)

    # 2) bf16 input (bf16 DMA; bf16 compute on v6e/v7x, f32 on v5e/unknown)
    x_bf16 = x.astype(jnp.bfloat16)
    loss_bf16 = label_smoothing_loss(x_bf16, target, smoothing=smoothing)
    jax.block_until_ready(loss_bf16)
    ref_bf16 = _reference_loss(x_bf16, target, smoothing)
    assert jnp.allclose(loss_bf16, ref_bf16, atol=5e-2, rtol=2e-2), (loss_bf16, ref_bf16)

    # 3) multi-tile path with a ragged last tile (forced small tile)
    N2 = 20
    x2 = jax.random.normal(kx2, (N2, C), dtype=jnp.float32)
    target2 = jax.random.randint(kt2, (N2,), 0, C, dtype=jnp.int32)
    loss2 = label_smoothing_loss(x2, target2, smoothing=smoothing, tile_n=8)
    jax.block_until_ready(loss2)
    ref2 = _reference_loss(x2, target2, smoothing)
    assert jnp.allclose(loss2, ref2, atol=1e-5, rtol=1e-5), (loss2, ref2)

    print("KERNEL_OK")
</pallas_src>

<mosaic_0001>
module attributes {stable_mosaic.version = 11 : i64} {
  func.func @_label_smoothing_kernel(%arg0: i32, %arg1: memref<8x32xf32, #tpu.memory_space<vmem>>, %arg2: memref<8x1xi32, #tpu.memory_space<vmem>>, %arg3: memref<1x128xf32, #tpu.memory_space<vmem>>) attributes {dimension_semantics = [#tpu.dimension_semantics<parallel>], iteration_bounds = array<i64: 1>, scalar_prefetch = 0 : i64, scratch_operands = 0 : i64, tpu.core_type = #tpu.core_type<tc>, window_params = [{transform_indices = @transform_0, window_bounds = array<i64: 8, 32>}, {transform_indices = @transform_1, window_bounds = array<i64: 8, 1>}, {transform_indices = @transform_2, window_bounds = array<i64: 1, 128>}]} {
    %c0 = arith.constant 0 : index
    %c0_0 = arith.constant 0 : index
    %0 = vector.load %arg1[%c0, %c0_0] : memref<8x32xf32, #tpu.memory_space<vmem>>, vector<8x32xf32>
    %cst = arith.constant dense<0xFF800000> : vector<8xf32>
    %1 = vector.multi_reduction <maximumf>, %0, %cst [1] : vector<8x32xf32> to vector<8xf32>
    %2 = vector.shape_cast %1 : vector<8xf32> to vector<8x1xf32>
    %3 = vector.broadcast %2 : vector<8x1xf32> to vector<8x32xf32>
    %4 = arith.subf %0, %3 : vector<8x32xf32>
    %5 = math.exp %4 : vector<8x32xf32>
    %cst_1 = arith.constant dense<0.000000e+00> : vector<8xf32>
    %6 = vector.multi_reduction <add>, %5, %cst_1 [1] : vector<8x32xf32> to vector<8xf32>
    %7 = vector.shape_cast %6 : vector<8xf32> to vector<8x1xf32>
    %8 = math.log %7 : vector<8x1xf32>
    %c0_2 = arith.constant 0 : index
    %c0_3 = arith.constant 0 : index
    %9 = vector.load %arg2[%c0_2, %c0_3] : memref<8x1xi32, #tpu.memory_space<vmem>>, vector<8x1xi32>
    %10 = tpu.iota {dimensions = array<i32: 1>} : vector<8x32xi32>
    %11 = vector.broadcast %9 : vector<8x1xi32> to vector<8x32xi32>
    %12 = arith.cmpi eq, %10, %11 : vector<8x32xi32>
    %cst_4 = arith.constant 0.903124988 : f32
    %cst_5 = arith.constant 3.125000e-03 : f32
    %13 = vector.broadcast %cst_4 : f32 to vector<8x32xf32>
    %14 = vector.broadcast %cst_5 : f32 to vector<8x32xf32>
    %15 = arith.select %12, %13, %14 : vector<8x32xi1>, vector<8x32xf32>
    %16 = arith.mulf %4, %15 : vector<8x32xf32>
    %cst_6 = arith.constant dense<0.000000e+00> : vector<8xf32>
    %17 = vector.multi_reduction <add>, %16, %cst_6 [1] : vector<8x32xf32> to vector<8xf32>
    %18 = vector.shape_cast %17 : vector<8xf32> to vector<8x1xf32>
    %19 = arith.subf %8, %18 : vector<8x1xf32>
    %20 = tpu.iota {dimensions = array<i32: 0>} : vector<8x1xi32>
    %c8_i32 = arith.constant 8 : i32
    %21 = arith.muli %arg0, %c8_i32 : i32
    %22 = vector.broadcast %21 : i32 to vector<8x1xi32>
    %23 = arith.addi %20, %22 : vector<8x1xi32>
    %c8_i32_7 = arith.constant 8 : i32
    %24 = vector.broadcast %c8_i32_7 : i32 to vector<8x1xi32>
    %25 = arith.cmpi slt, %23, %24 : vector<8x1xi32>
    %cst_8 = arith.constant 0.000000e+00 : f32
    %26 = vector.broadcast %cst_8 : f32 to vector<8x1xf32>
    %27 = arith.select %25, %19, %26 : vector<8x1xi1>, vector<8x1xf32>
    %28 = vector.shape_cast %27 : vector<8x1xf32> to vector<1x8x1xf32>
    %cst_9 = arith.constant dense<0.000000e+00> : vector<1xf32>
    %29 = vector.multi_reduction <add>, %28, %cst_9 [1, 2] : vector<1x8x1xf32> to vector<1xf32>
    %30 = vector.shape_cast %29 : vector<1xf32> to vector<1x1x1xf32>
    %31 = vector.extract %30[0, 0, 0] : f32 from vector<1x1x1xf32>
    %32 = vector.broadcast %31 : f32 to vector<1x128xf32>
    %c0_10 = arith.constant 0 : index
    %c0_11 = arith.constant 0 : index
    %33 = vector.load %arg3[%c0_10, %c0_11] : memref<1x128xf32, #tpu.memory_space<vmem>>, vector<1x128xf32>
    tpu.vector_store %arg3[%c0_10, %c0_11], %32 {strides = array<i32>} : memref<1x128xf32, #tpu.memory_space<vmem>>, vector<1x128xf32>,
    return
  }
  func.func @transform_0(%arg0: i32) -> (i32, i32) {
    %c0_i32 = arith.constant 0 : i32
    %c0_i32_0 = arith.constant 0 : i32
    return %arg0, %c0_i32 : i32, i32
  }
  func.func @transform_1(%arg0: i32) -> (i32, i32) {
    %c0_i32 = arith.constant 0 : i32
    %c0_i32_0 = arith.constant 0 : i32
    return %arg0, %c0_i32 : i32, i32
  }
  func.func @transform_2(%arg0: i32) -> (i32, i32) {
    %c0_i32 = arith.constant 0 : i32
    %c0_i32_0 = arith.constant 0 : i32
    return %arg0, %c0_i32 : i32, i32
  }
}

</mosaic_0001>

<bundles_post_ra>
// kernel: tpu_custom_call.1
= control target key start
LH: loop header
LB: loop body
LE: loop exit
PB: predicated region body
PF: predicated region fallthrough
CT: control target
= control target key end

     0   :  { %vm13_vm0 = vcmask 261120   ;;  %s140_s0 = inlined_call_operand.vmem [shape: f32[8,32], index: 0, kind: input, shape index: {}]   ;;  %s141_s1 = inlined_call_operand.vmem [shape: s32[8,1], index: 1, kind: input, shape index: {}]   ;;  %s142_s2 = inlined_call_operand.hbm [shape: f32[1,128], index: 2, kind: output, shape index: {}]  }
   0x1   :  { %v12_v0 = vld [vmem:[%s140_s0] sm:$0xff] }
   0x2   :  { %7 = vsyncpa [#allocation3], 0  ;;  %v14_v1 = vsel %vm13_vm0, %v12_v0, -inf  ;;  %v110_v2 = vmov 0   ;;  %v25_v3 = vld [vmem:[%s141_s1] sm:$0xff]  ;;  %v26_v9 = vlaneseq  ;;  %vm45_vm2 = vcmask 7168  }
   0x3   :  { %79 = vset.pattern.permute.xlu0 %v110_v2  ;;  %v111_v12 = vmov 0.003125   ;;  %s112_s0 = smov [#allocation2]   ;;  %s65_s15 = sshll.u32 %s142_s2, 4  ;;  %s66_s15 = int_to_ptr.hbm [resolvable:$true] %s65_s15 }
   0x4   :  { %15 = vmax.xlane.f32.xlu0 %v14_v1  ;;  %v27_v10 = vand.u32 127, %v26_v9  ;;  %s63_s1 = sshll.u32 %s112_s0, 4  ;;  %s64_s1 = int_to_ptr.vmem [resolvable:$true] %s63_s1 }
  0x18   :  { %29 = vperm.xlu0 %79, %v25_v3  }
  0x77   :  { %v16_v4 = vpop.xlane.xlu0 %15 }
  0x78   :  { %v17_v5 = vsub.f32 %v12_v0, %v16_v4 }
  0x7a   :  { %v18_v6 = vmul.f32 1.442695, %v17_v5 }
  0x7c   :  { %80 = vpow2.f32 %v18_v6 }
  0x82   :  { %v81_v7 = vpop.eup %80 }
  0x83   :  { %v20_v8 = vsel %vm13_vm0, %v81_v7, 0.0 }
  0x84   :  { %21 = vadd.xlane.f32.xlu1 %v20_v8 }
  0x8a   :  { %v30_v11 = vpop.permute.xlu0 %29 }
  0x8b   :  { %vm31_vm1 = vcmp.eq.s32.totalorder %v27_v10, %v30_v11 }
  0x8c   :  { %v32_v13 = vsel %vm31_vm1, 0.903125, %v111_v12 }
  0x8d   :  { %v33_v14 = vmul.f32 %v32_v13, %v17_v5 }
  0x8f   :  { %v34_v15 = vsel %vm13_vm0, %v33_v14, 0.0 }
  0x90   :  { %35 = vadd.xlane.f32.xlu1 %v34_v15 }
  0xf7   :  { %v22_v16 = vpop.xlane.xlu1 %21 }
  0xf8   :  { %82 = vlog2.f32 %v22_v16 }
  0xfe   :  { %v83_v17 = vpop.eup %82 }
  0xff   :  { %v24_v18 = vmul.f32 0.6931472, %v83_v17 }
 0x103   :  { %v36_v19 = vpop.xlane.xlu1 %35 }
 0x104   :  { %v37_v20 = vsub.f32 %v24_v18, %v36_v19 }
 0x106   :  { %v46_v21 = vsel %vm45_vm2, %v37_v20, 0.0 }
 0x107   :  { %47 = vadd.xlane.f32.xlu2 %v46_v21 }
 0x17a   :  { %v48_v22 = vpop.xlane.xlu2 %47 }
 0x17b   :  { %v49_v23 = vrot.slane %v48_v22, 4 }
 0x17d   :  { %v50_v24 = vadd.f32 %v49_v23, %v48_v22 }
 0x17f   :  { %v51_v25 = vrot.slane %v50_v24, 2 }
 0x181   :  { %v52_v26 = vadd.f32 %v51_v25, %v50_v24 }
 0x183   :  { %v53_v27 = vrot.slane %v52_v26, 1 }
 0x185   :  { %v54_v28 = vadd.f32 %v53_v27, %v52_v26 }
 0x187   :  { %74 = vpush %v54_v28 }
 0x1b8   :  { %s75_s16 = spop %74 }
 0x1b9   :  { %v56_v29 = vstv %s75_s16 }
 0x1ba   :  { %57 = vst [vmem:[#allocation2] sm:$0x1] %v56_v29 }
 0x1bb   :  { %68 = dma.vmem_to_hbm [thread:$0]  %s64_s1, 16, %s66_s15, [#allocation3]  }
 0x1bc   :  { %108 = dma.done.wait [#allocation3], 16  }
 0x1bd   :  { %109 = vsyncadd [#allocation3], 4294967280 }
 0x1be   :  { %73 = vsyncpa [#allocation3], 1 }

</bundles_post_ra>
